<compile_context>
chip_gen: v5e
topology: v5e:2x2
jax: 0.10.0
libtpu: 0.0.40
codegen_flags: <defaults>
</compile_context>

<pallas_src>
import math

import jax
import jax.numpy as jnp
import numpy as np
from jax.experimental import pallas as pl
from jax.experimental.pallas import tpu as pltpu

_LANE = 128                       # TPU lane width (last-dim granularity)
_MAX_WIDTH = 4096                 # cap on lane-dense slab width (elements)
_MAX_BLOCK_BYTES = 2 * 1024 * 1024  # per-buffer block cap (v5e-safe w/ 2x2 dbl-buf)


def _identity_kernel(x_ref, o_ref):
    # Hot path: straight VMEM load -> store (identity forward).
    o_ref[...] = x_ref[...]


def _choose_layout(total):
    """Factor `total` into (rows, cols) with a wide lane-dense cols."""
    max_w = min(total, _MAX_WIDTH)
    widths = [w for w in range(_LANE, max_w + 1, _LANE) if total % w == 0]
    if not widths:
        # Odd total: single row, full-array block (legal: block == array dims).
        return 1, total
    wide = [w for w in widths if total // w >= 8]
    cols = max(wide) if wide else max(widths)
    return total // cols, cols


def _row_tile(rows, cols, itemsize):
    """Row-tile: multiple of 8, block bytes <= _MAX_BLOCK_BYTES (or full rows)."""
    if rows < 8:
        return rows  # full-array block along rows (legal: equals array dim)
    cap = max(8, (_MAX_BLOCK_BYTES // (cols * itemsize)) // 8 * 8)
    return min(cap, (rows // 8) * 8)


def _pallas_identity_2d(x2d):
    rows, cols = x2d.shape
    itemsize = jnp.dtype(x2d.dtype).itemsize
    tr = _row_tile(rows, cols, itemsize)
    grid = (pl.cdiv(rows, tr),)   # ragged tail (if any) is masked by Pallas
    return pl.pallas_call(
        _identity_kernel,
        out_shape=jax.ShapeDtypeStruct((rows, cols), x2d.dtype),
        grid_spec=pltpu.PrefetchScalarGridSpec(
            num_scalar_prefetch=0,
            grid=grid,
            in_specs=[pl.BlockSpec((tr, cols), lambda i: (i, 0))],
            out_specs=pl.BlockSpec((tr, cols), lambda i: (i, 0)),
        ),
        # Identity: alias the output onto the input buffer (no extra HBM
        # allocation; true zero-copy when the caller donates the input).
        input_output_aliases={0: 0},
        compiler_params=pltpu.CompilerParams(
            dimension_semantics=("parallel",)),
    )(x2d)


class YoloParameter:
    """JAX/Pallas port of the PyTorch YoloParameter module (identity forward)."""

    def __init__(self, anchor_mask=(), num_classes=0, anchors=(),
                 num_anchors=1, stride=32, model_out=False):
        self.anchor_mask = list(anchor_mask)
        self.num_classes = num_classes
        self.anchors = list(anchors)
        self.num_anchors = num_anchors
        self.anchor_step = len(self.anchors) // num_anchors
        self.coord_scale = 1
        self.noobject_scale = 1
        self.object_scale = 5
        self.class_scale = 1
        self.thresh = 0.6
        self.stride = stride
        self.seen = 0
        self.scale_x_y = 1
        self.model_out = model_out
        # No learnable parameters in this module (nothing to initialize).

    def forward(self, output):
        # NOTE: the truly optimal forward is `return output` (documented
        # identity).  The explicit aliased Pallas copy below keeps a kernel
        # boundary while staying at the HBM-roofline / zero-copy floor.
        shape = output.shape
        total = int(math.prod(shape))
        rows, cols = _choose_layout(total)
        flat = output.reshape(rows, cols)      # metadata-only on contiguous NCHW
        out = _pallas_identity_2d(flat)        # hot path: aliased, tiled identity
        return out.reshape(shape)

    __call__ = forward


if __name__ == "__main__":
    key = jax.random.PRNGKey(0)
    # YOLO head output: batch=2, num_anchors=3, num_classes=2
    # -> channels = num_anchors * (5 + num_classes) = 21, spatial 16x16.
    anchors = [1.0, 1.5, 2.0, 3.0, 4.0, 5.0]
    layer = YoloParameter(anchor_mask=[0, 1, 2], num_classes=2,
                          anchors=anchors, num_anchors=3, stride=32)

    x = jax.random.normal(key, (2, 21, 16, 16), dtype=jnp.float32)
    x_ref = np.asarray(jax.device_get(x))      # snapshot before (aliasing-safe)

    y = layer(x)
    jax.block_until_ready(y)

    assert y.shape == x_ref.shape and y.dtype == x_ref.dtype
    assert np.array_equal(np.asarray(jax.device_get(y)), x_ref)
    print("KERNEL_OK")
</pallas_src>

<mosaic_0001>
module attributes {stable_mosaic.version = 11 : i64} {
  func.func @_identity_kernel(%arg0: i32, %arg1: memref<8x896xf32, #tpu.memory_space<vmem>>, %arg2: memref<8x896xf32, #tpu.memory_space<vmem>>) attributes {dimension_semantics = [#tpu.dimension_semantics<parallel>], iteration_bounds = array<i64: 2>, scalar_prefetch = 0 : i64, scratch_operands = 0 : i64, tpu.core_type = #tpu.core_type<tc>, window_params = [{transform_indices = @transform_0, window_bounds = array<i64: 8, 896>}, {transform_indices = @transform_1, window_bounds = array<i64: 8, 896>}]} {
    %c0 = arith.constant 0 : index
    %c0_0 = arith.constant 0 : index
    %0 = vector.load %arg1[%c0, %c0_0] : memref<8x896xf32, #tpu.memory_space<vmem>>, vector<8x896xf32>
    %c0_1 = arith.constant 0 : index
    %c0_2 = arith.constant 0 : index
    %1 = vector.load %arg2[%c0_1, %c0_2] : memref<8x896xf32, #tpu.memory_space<vmem>>, vector<8x896xf32>
    tpu.vector_store %arg2[%c0_1, %c0_2], %0 {strides = array<i32>} : memref<8x896xf32, #tpu.memory_space<vmem>>, vector<8x896xf32>,
    return
  }
  func.func @transform_0(%arg0: i32) -> (i32, i32) {
    %c0_i32 = arith.constant 0 : i32
    %c0_i32_0 = arith.constant 0 : i32
    return %arg0, %c0_i32 : i32, i32
  }
  func.func @transform_1(%arg0: i32) -> (i32, i32) {
    %c0_i32 = arith.constant 0 : i32
    %c0_i32_0 = arith.constant 0 : i32
    return %arg0, %c0_i32 : i32, i32
  }
}

</mosaic_0001>

<bundles_post_ra>
// kernel: tpu_custom_call.1
= control target key start
LH: loop header
LB: loop body
LE: loop exit
PB: predicated region body
PF: predicated region fallthrough
CT: control target
= control target key end

     0   :  { %6 = vsyncpa [#allocation3], 0  ;;  %s519_s0 = inlined_call_operand.hbm [shape: f32[12,896], index: 0, kind: input, shape index: {}, may-alias: {0,1}]   ;;  %s520_s1 = inlined_call_operand.hbm [shape: f32[12,896], index: 1, kind: output, shape index: {}, may-alias: {0,1}]  }
   0x1   :  { %8 = vsyncpa [#allocation3 + $0x1], 0 }
   0x2   :  { %9 = vsyncpa [#allocation4], 0 }
   0x3   :  { %11 = vsyncpa [#allocation4 + $0x1], 0  ;;  %s402_s6 = smov 0   ;;  %s404_s7 = smov 0  }
   0x4   :  { %s406_s8 = smov 0   ;;  %s408_s9 = smov 0  }
   0x5 LB: > { %s423_s10 = sadd.s32 4294967295, %s390_s9   ;;  %s236_s11 = sadd.s32 4294967294, %s390_s9   ;;  %s390_s9 = sphi %s408_s9, %s528_s9   ;;  %s386_s8 = sphi %s406_s8, %s527_s8   ;;  %s382_s7 = sphi %s404_s7, %s526_s7   ;;  %s378_s6 = sphi %s402_s6, %s525_s6  }
   0x6   : > { %s427_s12 = sadd.s32 1, %s390_s9   ;;  %s24_s13 = sadd.s32 1, %s386_s8 }
   0x7   : > { %s21_s14 = ssub.s32 %s390_s9, %s427_s12  ;;  %p31_p0 = scmp.ne.s32.totalorder %s386_s8, %s382_s7 }
   0x8   : > { %p22_p1 = scmp.eq.s32.totalorder %s21_s14, 0  ;;  %p32_p2 = scmp.eq.s32.totalorder %s390_s9, 0 }
   0x9   : > { %p37_p3 = scmp.ne.s32.totalorder %s382_s7, %s378_s6  ;;  %p38_p4 = scmp.eq.s32.totalorder %s423_s10, 0 }
   0xa   : > { %s439_s15 = scalar_select %p22_p1, %s386_s8, %s24_s13  }
   0xb   : > { %p33_p5 = por %p32_p2, %p31_p0  ;;  %p441_p6 = por %p38_p4, %p37_p3 }
   0xc   : > { %p61_p7 = scmp.eq.s32.totalorder %s423_s10, 1  ;;  %p67_p8 = scmp.eq.s32.totalorder %s236_s11, 1 }
   0xd   : > { %p238_p9 = scmp.ge.s32.totalorder %s390_s9, 2  ;;  %p260_p10 = scmp.lt.s32.totalorder %s390_s9, 2 }
   0xe   : > { %p448_p11 = por %p61_p7, %p31_p0  ;;  %p452_p12 = por %p67_p8, %p37_p3 }
   0xf   : > { %s87_s19 = sand.u32 1, %s386_s8   ;;  %s245_s20 = smul.u32 56, %s390_s9 }
  0x10   : > { %s244_s21 = smul.u32 56, %s87_s19  ;;  %p461_p13 = pnand %p260_p10, %p33_p5 }
  0x11   : > { %s96_s24 = scalar_lea.hbm %s519_s0, %s245_s20  ;;  %s88_s29 = scalar_lea.sflag [#allocation3], %s87_s19 }
  0x12   : > { %s98_s26 = sshll.u32 %s96_s24, 4  ;;  %s91_s27 = scalar_lea.vmem [#allocation2], %s244_s21  ;;  %s99_s26 = int_to_ptr.hbm [resolvable:$true] %s98_s26 }
  0x13   : > { %s100_s28 = sshll.u32 %s91_s27, 4  ;;  %s294_s30 = sshra.s32 %s99_s26, 4  ;;  %s101_s28 = int_to_ptr.vmem [resolvable:$true] %s100_s28  ;;  %s295_s30 = int_to_ptr.hbm [resolvable:$true] %s294_s30 }
  0x14   : > { %s296_s2 = scalar_lea.hbm %s295_s30, 56  ;;  %p298_p1 = pneg %p461_p13 }
  0x15   : > { %p297_p0 = scmp.ne.s32.totalorder %s295_s30, %s296_s2  ;;  %s301_s5 = scalar_lea.hbm %s519_s0, 112 }
  0x16   : > { %p302_p4 = scmp.lt.s32.totalorder %s295_s30, %s519_s0  ;;  %p303_p5 = scmp.lt.s32.totalorder %s301_s5, %s296_s2 }
  0x17   : > { %p299_p2 = pnand %p298_p1, %p297_p0 }
  0x18   : > { %p304_p7 = por %p303_p5, %p302_p4 }
  0x19   : > { %p300_p3 = pneg %p299_p2 }
  0x1b   : > { %p305_p8 = pnand %p304_p7, %p300_p3 }
  0x1d   : > { %308 = shalt.err (!%p305_p8)
}
  0x1e   : > { %255 = dma.hbm_to_vmem [thread:$0]  (!%p461_p13), %s99_s26, 896, %s101_s28, %s88_s29  }
  0x1f   : > { %p240_p10 = scmp.ge.s32.totalorder %s390_s9, 1  ;;  %p105_p0 = scmp.lt.s32.totalorder %s390_s9, 3 }
  0x21   : > { %p106_p1 = pnand %p240_p10, %p105_p0 }
  0x22   : > { %s478_s14 = sand.u32 (!%p106_p1), 1, %s382_s7  }
  0x23   : > { %109 = sbr.rel (%p106_p1) target bundleno = 57 (0x39), region = 24  ;;  %s112_s20 = scalar_lea.sflag (!%p106_p1), [#allocation3], %s478_s14 }
  0x24   : > { %s246_s19 = smul.u32 (!%p106_p1), 56, %s478_s14 }
  0x26   : > { %s115_s21 = scalar_lea.vmem (!%p106_p1), [#allocation2], %s246_s19 }
  0x28   : > { %369 = dma.done.wait (%p441_p6), %s112_s20, 896  }
  0x29   : > { %371 = vsyncadd (%p441_p6), %s112_s20, 4294966400  ;;  %s247_s22 = smul.u32 56, %s423_s10  ;;  %v135_v0 = vld [vmem:[%s115_s21] sm:$0xff]  ;;  %v136_v1 = vld [vmem:[%s115_s21 + $0x8] sm:$0xff]  ;;  %s134_s26 = scalar_lea.vmem [#allocation5], %s246_s19 }
  0x2a   : > { %v137_v2 = vld [vmem:[%s115_s21 + $0x10] sm:$0xff]  ;;  %142 = vst [vmem:[%s134_s26] sm:$0xff] %v135_v0  ;;  %v138_v3 = vld [vmem:[%s115_s21 + $0x18] sm:$0xff]  ;;  %v139_v4 = vld [vmem:[%s115_s21 + $0x20] sm:$0xff]  ;;  %s163_s27 = sshll.u32 %s134_s26, 4  ;;  %s150_s10 = scalar_lea.sflag [#allocation4], %s478_s14  ;;  %s164_s27 = int_to_ptr.vmem [resolvable:$true] %s163_s27 }
  0x2b   : > { %s161_s25 = scalar_lea.hbm %s520_s1, %s247_s22  ;;  %143 = vst [vmem:[%s134_s26 + $0x8] sm:$0xff] %v136_v1  ;;  %v140_v5 = vld [vmem:[%s115_s21 + $0x28] sm:$0xff]  ;;  %v141_v6 = vld [vmem:[%s115_s21 + $0x30] sm:$0xff]  ;;  %s344_s3 = scalar_lea.hbm %s520_s1, 112 }
  0x2c   : > { %s165_s28 = sshll.u32 %s161_s25, 4  ;;  %144 = vst [vmem:[%s134_s26 + $0x10] sm:$0xff] %v137_v2  ;;  %s166_s28 = int_to_ptr.hbm [resolvable:$true] %s165_s28 }
  0x2d   : > { %145 = vst [vmem:[%s134_s26 + $0x18] sm:$0xff] %v138_v3  ;;  %s338_s16 = sshra.s32 %s166_s28, 4  ;;  %s339_s16 = int_to_ptr.hbm [resolvable:$true] %s338_s16 }
  0x2e   : > { %146 = vst [vmem:[%s134_s26 + $0x20] sm:$0xff] %v139_v4  ;;  %s340_s29 = scalar_lea.hbm %s339_s16, 56  ;;  %p345_p3 = scmp.lt.s32.totalorder %s339_s16, %s520_s1 }
  0x2f   : > { %147 = vst [vmem:[%s134_s26 + $0x28] sm:$0xff] %v140_v5  ;;  %p341_p6 = scmp.ne.s32.totalorder %s339_s16, %s340_s29  ;;  %p346_p4 = scmp.lt.s32.totalorder %s344_s3, %s340_s29 }
  0x30   : > { %148 = vst [vmem:[%s134_s26 + $0x30] sm:$0xff] %v141_v6 }
  0x31   : > { %p342_p13 = pnand %p341_p6, %p448_p11  ;;  %p347_p5 = por %p346_p4, %p345_p3 }
  0x33   : > { %p343_p2 = pneg %p342_p13 }
  0x35   : > { %p348_p7 = pnand %p347_p5, %p343_p2 }
  0x37   : > { %351 = shalt.err (!%p348_p7)
}
  0x38   : > { %250 = dma.vmem_to_hbm [thread:$0]  (%p448_p11), %s164_s27, 896, %s166_s28, %s150_s10  }
  0x39 PF: > { %s177_s11 = sand.u32 1, %s378_s6   ;;  %p257_p8 = pnand %p238_p9, %p452_p12 }
  0x3a   : > { %s178_s13 = scalar_lea.sflag [#allocation4], %s177_s11 }
  0x3b   : > { %p258_p10 = pneg %p257_p8 }
  0x3d   : > { %373 = dma.done.wait (%p258_p10), %s178_s13, 896  }
  0x3e   : > { %375 = vsyncadd (%p258_p10), %s178_s13, 4294966400  ;;  %p14_p0 = scmp.ge.s32.totalorder %s427_s12, 4   ;;  %s525_s6 = smov %s382_s7 }
  0x3f   : > { %s526_s7 = smov %s386_s8  ;;  %s527_s8 = smov %s439_s15 }
  0x40   : > { %s528_s9 = smov %s427_s12  ;;  %16 = sbr.rel (!%p14_p0) target bundleno = 5 (0x5), region = 69 }
  0x45   :  { %184 = vsyncpa [#allocation3], 1 }
  0x46   :  { %186 = vsyncpa [#allocation3 + $0x1], 1 }
  0x47   :  { %187 = vsyncpa [#allocation4], 1 }
  0x48   :  { %189 = vsyncpa [#allocation4 + $0x1], 1 }

</bundles_post_ra>
